<compile_context>
chip_gen: v5e
topology: v5e:2x2
jax: 0.10.0
libtpu: 0.0.40
codegen_flags: <defaults>
</compile_context>

<pallas_src>
import math

import jax
import jax.numpy as jnp
import numpy as np
from jax import lax
from jax.experimental import pallas as pl
from jax.experimental.pallas import tpu as pltpu


def _make_label_loss_kernel(temperature):
    # Fold sqrt(temperature) into the per-row normalization scale:
    #   (sqrt(t)*a/|a|) . (sqrt(t)*b/|b|) == t * cos(a, b)
    sqrt_temp = float(math.sqrt(float(temperature)))

    def kernel(ids_col_ref, ids_row_ref, feats_ref, loss_ref):
        feats = feats_ref[...].astype(jnp.float32)              # [B, F]
        B = feats.shape[0]

        # Row normalization (EUP rsqrt, no divide; sqrt(x+1e-8) >= 1e-4 so the
        # reference's max(., 1e-8) clamp is dead code).
        sumsq = jnp.sum(feats * feats, axis=1, keepdims=True)   # [B, 1]
        fn = feats * (lax.rsqrt(sumsq + 1e-8) * sqrt_temp)      # [B, F]

        # Scaled cosine matrix straight off the MXU: cos[i,j] = t * cosine(f_i, f_j)
        cos = lax.dot_general(fn, fn, (((1,), (1,)), ((), ())),
                              preferred_element_type=jnp.float32)  # [B, B]

        # Single off-diagonal mask, reused for the LSE and the same-id mask.
        row = lax.broadcasted_iota(jnp.int32, (B, B), 0)
        col = lax.broadcasted_iota(jnp.int32, (B, B), 1)
        offdiag = row != col

        # logsumexp over all off-diagonal logits (exp(-inf)=0 does the masking).
        masked = jnp.where(offdiag, cos, jnp.float32(-jnp.inf))
        m = jnp.max(masked, keepdims=True)                      # (1, 1)
        sumexp = jnp.sum(jnp.exp(masked - m), keepdims=True)    # (1, 1)
        lse = m + jnp.log(sumexp)

        # Same-id (off-diagonal) mean — ids rounded & compared in-kernel (VPU).
        ids_c = jnp.round(ids_col_ref[...].astype(jnp.float32))  # [B, 1]
        ids_r = jnp.round(ids_row_ref[...].astype(jnp.float32))  # [1, B]
        sim = jnp.logical_and(ids_c == ids_r, offdiag)            # [B, B]
        sim_f = sim.astype(jnp.float32)
        sim_sum = jnp.sum(cos * sim_f, keepdims=True)             # (1, 1)
        sim_cnt = jnp.sum(sim_f, keepdims=True)                   # (1, 1)

        # NaN if sim_cnt == 0 — same as the reference / PyTorch module.
        loss11 = lse - sim_sum / sim_cnt                          # (1, 1)
        loss_ref[0, 0] = loss11[0, 0]                             # scalar -> SMEM

    return kernel


def label_loss(ids, feats, temperature=0.07):
    B, F = feats.shape

    # Raw ids in both orientations; rounding/compare happen inside the kernel.
    ids_col = jnp.reshape(ids, (B, 1))   # native shape -> no-op view
    ids_row = jnp.reshape(ids, (1, B))   # single tiny reshape (kernel can't relayout minor dims)

    cost = pl.CostEstimate(
        flops=2 * B * B * F + 8 * B * B,
        transcendentals=B * B + B,                   # exp per logit + rsqrt per row
        bytes_accessed=B * F * feats.dtype.itemsize + 2 * B * ids_col.dtype.itemsize + 4,
    )

    out = pl.pallas_call(
        _make_label_loss_kernel(temperature),
        out_shape=jax.ShapeDtypeStruct((1, 1), jnp.float32),
        in_specs=[
            pl.BlockSpec((B, 1), lambda: (0, 0)),
            pl.BlockSpec((1, B), lambda: (0, 0)),
            pl.BlockSpec((B, F), lambda: (0, 0)),    # true (unpadded) feature dim
        ],
        out_specs=pl.BlockSpec(memory_space=pltpu.MemorySpace.SMEM),
        cost_estimate=cost,
    )(ids_col, ids_row, feats)
    return out[0, 0]


def ref_loss(ids, feats, temperature):
    """Pure-JAX reference mirroring the PyTorch forward semantics."""
    B, _ = feats.shape
    norm = jnp.maximum(jnp.sqrt(jnp.sum(feats ** 2, axis=1) + 1e-8), 1e-8)
    cos = (feats @ feats.T) / (norm[:, None] * norm[None, :]) * temperature
    offdiag = ~jnp.eye(B, dtype=bool)
    idr = jnp.round(ids.reshape(B))
    sim = (idr[:, None] == idr[None, :]) & offdiag
    lse = jax.nn.logsumexp(jnp.where(offdiag, cos, -jnp.inf))
    sim_mean = jnp.sum(jnp.where(sim, cos, 0.0)) / jnp.sum(sim)
    return lse - sim_mean


if __name__ == "__main__":
    key = jax.random.PRNGKey(0)
    k1, k2 = jax.random.split(key)
    B, F = 8, 100  # small analogue of the module's [48, 1] ids and [48, 100] feats
    feats = jax.random.normal(k1, (B, F), jnp.float32)
    # float labels from 3 classes -> pigeonhole guarantees off-diagonal same-id pairs
    ids = jax.random.randint(k2, (B, 1), 0, 3).astype(jnp.float32)
    temperature = 0.07

    loss = jax.block_until_ready(label_loss(ids, feats, temperature))
    ref = jax.block_until_ready(ref_loss(ids, feats, temperature))
    np.testing.assert_allclose(np.array(loss), np.array(ref), rtol=1e-4, atol=1e-5)
    print("KERNEL_OK")
</pallas_src>

<mosaic_0001>
module attributes {stable_mosaic.version = 11 : i64} {
  func.func @kernel(%arg0: memref<8x1xf32, #tpu.memory_space<vmem>>, %arg1: memref<1x8xf32, #tpu.memory_space<vmem>>, %arg2: memref<8x100xf32, #tpu.memory_space<vmem>>, %arg3: memref<1x1xf32, #tpu.memory_space<smem>>) attributes {dimension_semantics = [], scalar_prefetch = 0 : i64, scratch_operands = 0 : i64, tpu.core_type = #tpu.core_type<tc>} {
    %c0 = arith.constant 0 : index
    %c0_0 = arith.constant 0 : index
    %0 = vector.load %arg2[%c0, %c0_0] : memref<8x100xf32, #tpu.memory_space<vmem>>, vector<8x100xf32>
    %1 = arith.mulf %0, %0 : vector<8x100xf32>
    %cst = arith.constant dense<0.000000e+00> : vector<8xf32>
    %2 = vector.multi_reduction <add>, %1, %cst [1] : vector<8x100xf32> to vector<8xf32>
    %3 = vector.shape_cast %2 : vector<8xf32> to vector<8x1xf32>
    %cst_1 = arith.constant 9.99999993E-9 : f32
    %4 = vector.broadcast %cst_1 : f32 to vector<8x1xf32>
    %5 = arith.addf %3, %4 : vector<8x1xf32>
    %6 = math.rsqrt %5 : vector<8x1xf32>
    %cst_2 = arith.constant 0.264575124 : f32
    %7 = vector.broadcast %cst_2 : f32 to vector<8x1xf32>
    %8 = arith.mulf %6, %7 : vector<8x1xf32>
    %9 = vector.broadcast %8 : vector<8x1xf32> to vector<8x100xf32>
    %10 = arith.mulf %0, %9 : vector<8x100xf32>
    %cst_3 = arith.constant dense<0.000000e+00> : vector<8x8xf32>
    %11 = tpu.matmul %10, %10, %cst_3 {dimension_numbers = #tpu.dot_dimension_numbers<[1], [1], [0], [0], [0, 0, 1, 0], [], []>} : vector<8x100xf32>, vector<8x100xf32>, vector<8x8xf32> -> vector<8x8xf32>
    %12 = tpu.iota {dimensions = array<i32: 0>} : vector<8x8xi32>
    %13 = tpu.iota {dimensions = array<i32: 1>} : vector<8x8xi32>
    %14 = arith.cmpi ne, %12, %13 : vector<8x8xi32>
    %cst_4 = arith.constant 0xFF800000 : f32
    %15 = vector.broadcast %cst_4 : f32 to vector<8x8xf32>
    %16 = arith.select %14, %11, %15 : vector<8x8xi1>, vector<8x8xf32>
    %17 = vector.shape_cast %16 : vector<8x8xf32> to vector<1x8x8xf32>
    %cst_5 = arith.constant dense<0xFF800000> : vector<1xf32>
    %18 = vector.multi_reduction <maximumf>, %17, %cst_5 [1, 2] : vector<1x8x8xf32> to vector<1xf32>
    %19 = vector.shape_cast %18 : vector<1xf32> to vector<1x1x1xf32>
    %20 = vector.extract %19[0, 0, 0] : f32 from vector<1x1x1xf32>
    %21 = vector.broadcast %20 : f32 to vector<1x1xf32>
    %22 = vector.broadcast %21 : vector<1x1xf32> to vector<8x8xf32>
    %23 = arith.subf %16, %22 : vector<8x8xf32>
    %24 = math.exp %23 : vector<8x8xf32>
    %25 = vector.shape_cast %24 : vector<8x8xf32> to vector<1x8x8xf32>
    %cst_6 = arith.constant dense<0.000000e+00> : vector<1xf32>
    %26 = vector.multi_reduction <add>, %25, %cst_6 [1, 2] : vector<1x8x8xf32> to vector<1xf32>
    %27 = vector.shape_cast %26 : vector<1xf32> to vector<1x1x1xf32>
    %28 = vector.extract %27[0, 0, 0] : f32 from vector<1x1x1xf32>
    %29 = vector.broadcast %28 : f32 to vector<1x1xf32>
    %30 = math.log %29 : vector<1x1xf32>
    %31 = arith.addf %21, %30 : vector<1x1xf32>
    %c0_7 = arith.constant 0 : index
    %c0_8 = arith.constant 0 : index
    %32 = vector.load %arg0[%c0_7, %c0_8] : memref<8x1xf32, #tpu.memory_space<vmem>>, vector<8x1xf32>
    %33 = math.roundeven %32 : vector<8x1xf32>
    %c0_9 = arith.constant 0 : index
    %c0_10 = arith.constant 0 : index
    %34 = vector.load %arg1[%c0_9, %c0_10] : memref<1x8xf32, #tpu.memory_space<vmem>>, vector<1x8xf32>
    %35 = math.roundeven %34 : vector<1x8xf32>
    %36 = vector.broadcast %33 : vector<8x1xf32> to vector<8x8xf32>
    %37 = vector.broadcast %35 : vector<1x8xf32> to vector<8x8xf32>
    %38 = arith.cmpf oeq, %36, %37 : vector<8x8xf32>
    %39 = arith.andi %38, %14 : vector<8x8xi1>
    %40 = arith.extui %39 : vector<8x8xi1> to vector<8x8xi32>
    %41 = arith.sitofp %40 : vector<8x8xi32> to vector<8x8xf32>
    %42 = arith.mulf %11, %41 : vector<8x8xf32>
    %43 = vector.shape_cast %42 : vector<8x8xf32> to vector<1x8x8xf32>
    %cst_11 = arith.constant dense<0.000000e+00> : vector<1xf32>
    %44 = vector.multi_reduction <add>, %43, %cst_11 [1, 2] : vector<1x8x8xf32> to vector<1xf32>
    %45 = vector.shape_cast %44 : vector<1xf32> to vector<1x1x1xf32>
    %46 = vector.extract %45[0, 0, 0] : f32 from vector<1x1x1xf32>
    %47 = vector.broadcast %46 : f32 to vector<1x1xf32>
    %48 = vector.shape_cast %41 : vector<8x8xf32> to vector<1x8x8xf32>
    %cst_12 = arith.constant dense<0.000000e+00> : vector<1xf32>
    %49 = vector.multi_reduction <add>, %48, %cst_12 [1, 2] : vector<1x8x8xf32> to vector<1xf32>
    %50 = vector.shape_cast %49 : vector<1xf32> to vector<1x1x1xf32>
    %51 = vector.extract %50[0, 0, 0] : f32 from vector<1x1x1xf32>
    %52 = vector.broadcast %51 : f32 to vector<1x1xf32>
    %53 = arith.divf %47, %52 : vector<1x1xf32>
    %54 = arith.subf %31, %53 : vector<1x1xf32>
    %55 = vector.extract %54[0, 0] : f32 from vector<1x1xf32>
    %c0_13 = arith.constant 0 : index
    %c0_14 = arith.constant 0 : index
    %56 = memref.load %arg3[%c0_13, %c0_14] : memref<1x1xf32, #tpu.memory_space<smem>>
    memref.store %55, %arg3[%c0_13, %c0_14] : memref<1x1xf32, #tpu.memory_space<smem>>
    return
  }
}

</mosaic_0001>

<bundles_post_ra>
// kernel: tpu_custom_call.1
= control target key start
LH: loop header
LB: loop body
LE: loop exit
PB: predicated region body
PF: predicated region fallthrough
CT: control target
= control target key end

     0   :  { %vm17_vm0 = vcmask 818176   ;;  %s266_s0 = inlined_call_operand.vmem [shape: f32[8,1], index: 0, kind: input, shape index: {}]   ;;  %s267_s1 = inlined_call_operand.vmem [shape: f32[1,8], index: 1, kind: input, shape index: {}]   ;;  %s268_s2 = inlined_call_operand.vmem [shape: f32[8,100], index: 2, kind: input, shape index: {}]   ;;  %s269_s3 = inlined_call_operand.hbm [shape: f32[1,1], index: 3, kind: output, shape index: {}]  }
   0x1   :  { %v15_v0 = vld [vmem:[%s268_s2] sm:$0xff] }
   0x2   :  { %8 = vsyncpa [#allocation3], 0  ;;  %v16_v1 = vmul.f32 %v15_v0, %v15_v0  ;;  %v92_v3 = vld [vmem:[%s266_s0] sm:$0xff]  ;;  %v221_v6 = vmov 0   ;;  %v57_v30 = vlaneseq  ;;  %v222_v36 = vmov 0.0   ;;  %s155_s21 = sshll.u32 %s269_s3, 4  ;;  %s156_s21 = int_to_ptr.hbm [resolvable:$true] %s155_s21 }
   0x3   :  { %v174_v4 = vcvt.f32.s32 %v92_v3  ;;  %v172_v5 = vand.u32 2147483647, %v92_v3  ;;  %197 = vset.pattern.permute.xlu1 %v221_v6  ;;  %v177_v8 = vand.u32 2147483648, %v92_v3  ;;  %198 = vset.pattern.permute.xlu0 %v221_v6  ;;  %v94_v23 = vld [vmem:[%s267_s1] sm:$0x1]  ;;  %vm63_vm9 = vcmask 64512  }
   0x4   :  { %v18_v2 = vsel %vm17_vm0, %v16_v1, 0.0  ;;  %v182_v24 = vcvt.f32.s32 %v94_v23  ;;  %v185_v27 = vand.u32 2147483648, %v94_v23  ;;  %v180_v28 = vand.u32 2147483647, %v94_v23  ;;  %s223_s23 = smov [#allocation2]  }
   0x5   :  { %19 = vadd.xlane.f32.xlu0 %v18_v2  ;;  %v175_v7 = vcvt.s32.f32 %v174_v4  ;;  %vm173_vm1 = vcmp.lt.f32.partialorder %v172_v5, 8388608.0  ;;  %v58_v33 = vshrl.u32 %v57_v30, 7  ;;  %v60_v34 = vand.u32 127, %v57_v30 }
   0x6   :  { %v183_v25 = vcvt.s32.f32 %v182_v24  ;;  %vm181_vm5 = vcmp.lt.f32.partialorder %v180_v28, 8388608.0 }
   0x7   :  { %v176_v9 = vand.u32 2147483647, %v175_v7  ;;  %vm61_vm6 = vcmp.ne.s32.totalorder %v58_v33, %v60_v34 }
   0x8   :  { %v184_v26 = vand.u32 2147483647, %v183_v25 }
   0x9   :  { %v178_v12 = vor.u32 %v177_v8, %v176_v9 }
   0xa   :  { %v186_v29 = vor.u32 %v185_v27, %v184_v26 }
   0xb   :  { %v179_v13 = vsel %vm173_vm1, %v178_v12, %v92_v3 }
   0xc   :  { %98 = vperm.xlu1 %197, %v179_v13   ;;  %v187_v31 = vsel %vm181_vm5, %v186_v29, %v94_v23 }
   0xd   :  { %v102_v32 = vperm.slane %v187_v31, 0 }
  0x78   :  { %v20_v10 = vpop.xlane.xlu0 %19 }
  0x79   :  { %v21_v11 = vadd.f32 1e-08, %v20_v10 }
  0x7b   :  { %199 = vrsqrt.f32 %v21_v11  ;;  %vm28_vm3 = vweird.f32 %v21_v11 }
  0x7e   :  { %v99_v35 = vpop.permute.xlu1 %98 }
  0x7f   :  { %vm104_vm7 = vcmp.eq.f32.partialorder %v99_v35, %v102_v32 }
  0x80   :  { %vm105_vm8 = vmand %vm104_vm7, %vm61_vm6 }
  0x81   :  { %v200_v14 = vpop.eup %199  ;;  %v167_v37 = vsel %vm105_vm8, 1.0, %v222_v36 }
  0x82   :  { %v23_v15 = vmul.f32 %v200_v14, %v21_v11  ;;  %vm29_vm2 = vweird.f32 %v200_v14  ;;  %v120_v43 = vsel %vm63_vm9, %v167_v37, 0.0 }
  0x83   :  { %vm30_vm4 = vmor %vm28_vm3, %vm29_vm2 }
  0x84   :  { %v24_v16 = vmul.f32 %v200_v14, %v23_v15 }
  0x86   :  { %v25_v17 = vmul.f32 0.5, %v24_v16 }
  0x88   :  { %v26_v18 = vsub.f32 1.5, %v25_v17 }
  0x8a   :  { %v27_v19 = vmul.f32 %v200_v14, %v26_v18 }
  0x8c   :  { %v31_v20 = vsel %vm30_vm4, %v200_v14, %v27_v19 }
  0x8d   :  { %v32_v21 = vmul.f32 0.26457512, %v31_v20 }
  0x8f   :  { %v33_v22 = vmul.f32 %v32_v21, %v15_v0 }
  0x91   :  { %165 = vmatpush.xpose.msk.msra.mxu0 %vm17_vm0, %v33_v22 }
  0x94   :  { %166 = vmatmul.msk.f32.vlgmr.msra.gmra.mxu0 %vm17_vm0, %v33_v22 }
 0x111   :  { %v54_v38 = vpop.f32.mrf.mxu0 }
 0x112   :  { %v62_v39 = vsel %vm61_vm6, %v54_v38, -inf  ;;  %v108_v40 = vmul.f32 %v167_v37, %v54_v38 }
 0x113   :  { %v64_v41 = vsel %vm63_vm9, %v62_v39, -inf }
 0x114   :  { %65 = vmax.xlane.f32.xlu0 %v64_v41  ;;  %v109_v42 = vsel %vm63_vm9, %v108_v40, 0.0 }
 0x115   :  { %110 = vadd.xlane.f32.xlu2 %v109_v42 }
 0x11d   :  { %121 = vadd.xlane.f32.xlu2 %v120_v43 }
 0x187   :  { %v66_v44 = vpop.xlane.xlu0 %65 }
 0x188   :  { %v67_v45 = vrot.slane %v66_v44, 4  ;;  %v111_v56 = vpop.xlane.xlu2 %110 }
 0x189   :  { %v112_v58 = vrot.slane %v111_v56, 4 }
 0x18a   :  { %v68_v46 = vmax.f32 %v66_v44, %v67_v45 }
 0x18b   :  { %v113_v60 = vadd.f32 %v112_v58, %v111_v56 }
 0x18c   :  { %v69_v47 = vrot.slane %v68_v46, 2 }
 0x18d   :  { %v114_v62 = vrot.slane %v113_v60, 2 }
 0x18e   :  { %v70_v48 = vmax.f32 %v68_v46, %v69_v47 }
 0x18f   :  { %v115_v3 = vadd.f32 %v114_v62, %v113_v60 }
 0x190   :  { %v71_v49 = vrot.slane %v70_v48, 1  ;;  %v122_v57 = vpop.xlane.xlu2 %121 }
 0x191   :  { %v123_v59 = vrot.slane %v122_v57, 4  ;;  %v116_v7 = vrot.slane %v115_v3, 1 }
 0x192   :  { %v72_v50 = vmax.f32 %v70_v48, %v71_v49 }
 0x193   :  { %v124_v61 = vadd.f32 %v123_v59, %v122_v57  ;;  %v117_v11 = vadd.f32 %v116_v7, %v115_v3 }
 0x194   :  { %168 = vpush %v72_v50 }
 0x195   :  { %v125_v0 = vrot.slane %v124_v61, 2 }
 0x197   :  { %v126_v4 = vadd.f32 %v125_v0, %v124_v61 }
 0x199   :  { %v127_v9 = vrot.slane %v126_v4, 1 }
 0x19b   :  { %v128_v12 = vadd.f32 %v127_v9, %v126_v4 }
 0x1c5   :  { %s259_s1 = spop %168 }
 0x1c6   :  { %v74_v51 = vstv %s259_s1 }
 0x1c7   :  { %v75_v52 = vsub.f32 %v62_v39, %v74_v51 }
 0x1c9   :  { %v76_v53 = vmul.f32 1.442695, %v75_v52 }
 0x1cb   :  { %201 = vpow2.f32 %v76_v53 }
 0x1d1   :  { %v202_v54 = vpop.eup %201 }
 0x1d2   :  { %v78_v55 = vsel %vm63_vm9, %v202_v54, 0.0 }
 0x1d3   :  { %79 = vadd.xlane.f32.xlu1 %v78_v55 }
 0x246   :  { %v80_v63 = vpop.xlane.xlu1 %79 }
 0x247   :  { %v81_v1 = vrot.slane %v80_v63, 4 }
 0x249   :  { %v82_v2 = vadd.f32 %v81_v1, %v80_v63 }
 0x24b   :  { %v83_v5 = vrot.slane %v82_v2, 2 }
 0x24d   :  { %v84_v6 = vadd.f32 %v83_v5, %v82_v2 }
 0x24f   :  { %v85_v8 = vrot.slane %v84_v6, 1 }
 0x251   :  { %v86_v10 = vadd.f32 %v85_v8, %v84_v6 }
 0x253   :  { %170 = vpush %v86_v10 }
 0x254   :  { %188 = vpush %v117_v11 }
 0x255   :  { %190 = vpush %v128_v12 }
 0x284   :  { %s171_s16 = spop %170 }
 0x285   :  { %s189_s17 = spop %188  ;;  %v88_v14 = vstv %s171_s16 }
 0x286   :  { %s191_s18 = spop %190  ;;  %v119_v26 = vstv %s189_s17 }
 0x287   :  { %v130_v13 = vstv %s191_s18 }
 0x288   :  { %203 = vrcp.f32 %v130_v13  ;;  %v142_v19 = vand.u32 2147483648, %v130_v13  ;;  %v140_v21 = vand.u32 2147483647, %v130_v13  ;;  %vm136_vm11 = vweird.f32 %v130_v13 }
 0x289   :  { %205 = vlog2.f32 %v88_v14 }
 0x28a   :  { %v143_v24 = vor.u32 1.1754944e-38, %v142_v19  ;;  %vm141_vm13 = vcmp.eq.f32.partialorder %v140_v21, 8.507059e+37 }
 0x28e   :  { %v204_v15 = vpop.eup %203 }
 0x28f   :  { %v132_v16 = vmul.f32 %v204_v15, %v130_v13  ;;  %v206_v18 = vpop.eup %205  ;;  %vm137_vm10 = vweird.f32 %v204_v15 }
 0x290   :  { %v90_v22 = vmul.f32 0.6931472, %v206_v18  ;;  %vm138_vm12 = vmor %vm136_vm11, %vm137_vm10 }
 0x291   :  { %v133_v17 = vsub.f32 1.0, %v132_v16 }
 0x292   :  { %v91_v28 = vadd.f32 %v90_v22, %v74_v51 }
 0x293   :  { %v134_v20 = vmul.f32 %v204_v15, %v133_v17 }
 0x295   :  { %v135_v23 = vadd.f32 %v204_v15, %v134_v20 }
 0x297   :  { %v139_v25 = vsel %vm138_vm12, %v204_v15, %v135_v23 }
 0x298   :  { %v144_v27 = vsel %vm141_vm13, %v143_v24, %v139_v25 }
 0x299   :  { %v145_v29 = vmul.f32 %v144_v27, %v119_v26 }
 0x29b   :  { %v146_v30 = vsub.f32 %v91_v28, %v145_v29 }
 0x29d   :  { %192 = vpush %v146_v30 }
 0x2ce   :  { %s193_s22 = spop %192 }
 0x2cf   :  { %149 = sst [smem:[#allocation2]] %s193_s22 }
 0x2d0   :  { %158 = dma.smem_to_hbm %s223_s23, 16, %s156_s21, [#allocation3]  }
 0x2d1   :  { %219 = dma.done.wait [#allocation3], 16  }
 0x2d2   :  { %220 = vsyncadd [#allocation3], 4294967280 }
 0x2d3   :  { %163 = sfence }
 0x2d4   :  { %164 = vsyncpa [#allocation3], 1 }

</bundles_post_ra>
